<compile_context>
chip_gen: v7x
topology: tpu7x:2x2x1
jax: 0.10.0
libtpu: 0.0.40
codegen_flags: <defaults>
</compile_context>

<pallas_src>
import functools
import numpy as np
import jax
import jax.numpy as jnp
from jax import lax
from jax.experimental import pallas as pl
from jax.experimental.pallas import tpu as pltpu


_LANE = 128
_SUB = 8
_NEG = -1e30          # column/row padding value for the row-major path


def _round_up(n, m):
    return ((n + m - 1) // m) * m


def _chip_budgets():
    """(pairwise-intermediate budget, tile budget, scoped-VMEM limit) in bytes."""
    try:
        kind = jax.devices()[0].device_kind.lower()
    except Exception:
        kind = ""
    if "v7" in kind:
        # v7x: 64 MiB physical VMEM per TensorCore -> halve budgets, cap limit.
        return 2 * 1024 * 1024, 2 * 1024 * 1024, 32 * 1024 * 1024
    # v5e / v6e: 128 MiB physical VMEM; raise the scoped default (16/32 MiB).
    return 4 * 1024 * 1024, 4 * 1024 * 1024, 64 * 1024 * 1024


# ---------------------------------------------------------------------------
# Kernels
# ---------------------------------------------------------------------------

def _sparsemax_lane_kernel(x_ref, o_ref):
    """Lane-dense path: x_ref (D, TL) f32, sparsemax along axis 0 per lane."""
    x = x_ref[...]
    x = x - jnp.max(x, axis=0, keepdims=True)                 # stability shift
    # relu_sum[j, l] = sum_i relu(x[i, l] - x[j, l]); reduce over the leading
    # axis -> pure VALU vreg adds, no cross-lane traffic.
    diff = x[:, None, :] - x[None, :, :]                      # (D, D, TL)
    relu_sum = jnp.sum(jnp.maximum(diff, 0.0), axis=0)        # (D, TL)
    support = (relu_sum < 1.0).astype(jnp.float32)            # (D, TL)
    supp_size = jnp.sum(support, axis=0, keepdims=True)       # (1, TL) == K
    supp_sum = jnp.sum(x * support, axis=0, keepdims=True)    # (1, TL)
    tau = (supp_sum - 1.0) * pl.reciprocal(supp_size, approx=False)
    o_ref[...] = jnp.maximum(x - tau, 0.0)


def _sparsemax_row_kernel(x_ref, o_ref, *, chunk, n_chunks):
    """Row-major path: x_ref (TR, Dp) f32, sparsemax along the last axis.

    Both the comparison index i and the output index j are processed in
    chunks of `chunk`, so the live pairwise intermediate is (TR, chunk, chunk)
    independent of Dp.  Only the per-row support size and support sum are
    carried across j-chunks (tau depends on nothing else).
    """
    x = x_ref[...]                                             # (TR, Dp)
    tr = x.shape[0]
    xmax = jnp.max(x, axis=-1, keepdims=True)                  # (TR, 1)
    xs = x - xmax                                              # stability shift

    def j_body(jc, carry):
        ssize, ssum = carry
        j0 = pl.multiple_of(jc * chunk, chunk)
        xj = x_ref[:, pl.ds(j0, chunk)]                        # (TR, C)

        def i_body(ic, acc):
            i0 = pl.multiple_of(ic * chunk, chunk)
            xi = x_ref[:, pl.ds(i0, chunk)]                    # (TR, C)
            # relu(x_i - x_j) is shift-invariant -> read chunks raw.
            diff = xi[:, :, None] - xj[:, None, :]             # (TR, C, C)
            # reduce over the sublane (second-to-last) axis
            return acc + jnp.sum(jnp.maximum(diff, 0.0), axis=1)

        relu_sum = lax.fori_loop(0, n_chunks, i_body,
                                 jnp.zeros((tr, chunk), jnp.float32))
        supp = (relu_sum < 1.0).astype(jnp.float32)            # (TR, C)
        ssize = ssize + jnp.sum(supp, axis=-1, keepdims=True)
        ssum = ssum + jnp.sum((xj - xmax) * supp, axis=-1, keepdims=True)
        return ssize, ssum

    init = (jnp.zeros((tr, 1), jnp.float32), jnp.zeros((tr, 1), jnp.float32))
    supp_size, supp_sum = lax.fori_loop(0, n_chunks, j_body, init)

    tau = (supp_sum - 1.0) * pl.reciprocal(supp_size, approx=False)
    o_ref[...] = jnp.maximum(xs - tau, 0.0)


# ---------------------------------------------------------------------------
# pallas_call wrappers
# ---------------------------------------------------------------------------

def _sparsemax_lanes(x2, tl):
    """x2: (D, Rp) f32 with Rp % tl == 0; sparsemax along axis 0."""
    D, Rp = x2.shape
    _, _, vmem_limit = _chip_budgets()
    return pl.pallas_call(
        _sparsemax_lane_kernel,
        out_shape=jax.ShapeDtypeStruct((D, Rp), jnp.float32),
        grid_spec=pltpu.PrefetchScalarGridSpec(
            num_scalar_prefetch=0,
            grid=(Rp // tl,),
            in_specs=[pl.BlockSpec((D, tl), lambda i: (0, i))],
            out_specs=pl.BlockSpec((D, tl), lambda i: (0, i)),
        ),
        compiler_params=pltpu.CompilerParams(
            dimension_semantics=("parallel",),
            vmem_limit_bytes=vmem_limit),
    )(x2)


def _sparsemax_rows(x2, tr, chunk):
    """x2: (Rp, Dp) f32, Rp % tr == 0, Dp % chunk == 0; sparsemax along axis 1."""
    Rp, Dp = x2.shape
    _, _, vmem_limit = _chip_budgets()
    kernel = functools.partial(_sparsemax_row_kernel,
                               chunk=chunk, n_chunks=Dp // chunk)
    return pl.pallas_call(
        kernel,
        out_shape=jax.ShapeDtypeStruct((Rp, Dp), jnp.float32),
        grid_spec=pltpu.PrefetchScalarGridSpec(
            num_scalar_prefetch=0,
            grid=(Rp // tr,),
            in_specs=[pl.BlockSpec((tr, Dp), lambda i: (i, 0))],
            out_specs=pl.BlockSpec((tr, Dp), lambda i: (i, 0)),
        ),
        compiler_params=pltpu.CompilerParams(
            dimension_semantics=("parallel",),
            vmem_limit_bytes=vmem_limit),
    )(x2)


# ---------------------------------------------------------------------------
# Public API (mirrors the PyTorch module's forward)
# ---------------------------------------------------------------------------

def sparsemax(x, dim=0):
    """Pallas-backed sparsemax along `dim`, same semantics as the PyTorch module."""
    orig_dtype = x.dtype
    D = x.shape[dim]
    pair_budget, tile_budget, _ = _chip_budgets()

    if D < _LANE:
        # -------- lane-dense path: reduced axis on sublanes, rows on lanes --------
        x_t = jnp.moveaxis(x, dim, 0).astype(jnp.float32)
        lead = x_t.shape[1:]
        rows = int(np.prod(lead)) if lead else 1
        x2 = x_t.reshape(D, rows)

        # Largest lane tile (multiple of 128) whose (D, D, TL) f32 pairwise
        # intermediate fits the budget; don't pad rows past one tile.
        tl = max(_LANE, (pair_budget // max(D * D * 4, 1)) // _LANE * _LANE)
        tl = min(tl, 4096, _round_up(rows, _LANE))
        rows_pad = _round_up(rows, tl)
        if rows_pad != rows:
            # zero columns: independent problems, discarded after the slice
            x2 = jnp.pad(x2, ((0, 0), (0, rows_pad - rows)))

        out2 = _sparsemax_lanes(x2, tl)
        out = out2[:, :rows].reshape((D,) + lead)
        out = jnp.moveaxis(out, 0, dim)
    else:
        # -------- row-major path: reduction on lanes, pairwise doubly chunked ----
        x_t = jnp.moveaxis(x, dim, -1).astype(jnp.float32)
        lead = x_t.shape[:-1]
        rows = int(np.prod(lead)) if lead else 1
        x2 = x_t.reshape(rows, D)

        chunk = _LANE
        d_pad = _round_up(D, chunk)
        # Row tile: bound the (TR, C, C) pairwise intermediate AND the (TR, Dp)
        # full-row tile (double-buffered in/out) independently of each other.
        tr = min(pair_budget // (chunk * chunk * 4),
                 tile_budget // max(d_pad * 4, 1)) // _SUB * _SUB
        tr = int(np.clip(tr, _SUB, 512))
        tr = min(tr, _round_up(rows, _SUB))
        rows_pad = _round_up(rows, tr)

        if rows_pad != rows or d_pad != D:
            # Column pad must be very negative so padded columns never enter
            # the support of real rows; padded rows are computed and discarded.
            x2 = jnp.pad(x2, ((0, rows_pad - rows), (0, d_pad - D)),
                         constant_values=_NEG)

        out2 = _sparsemax_rows(x2, tr, chunk)
        out = out2[:rows, :D].reshape(lead + (D,))
        out = jnp.moveaxis(out, -1, dim)

    return out.astype(orig_dtype)


class Sparsemax:
    """Mirror of the PyTorch nn.Module (forward only)."""

    def __init__(self, dim=0):
        self.dim = dim

    def __call__(self, x):
        return sparsemax(x, self.dim)
    # TODO(synk): backward (SparsemaxFunction.backward) not implemented; the
    # spec only requires the forward pass.


def _sparsemax_ref(x, dim=0):
    """Pure-JAX reference following the PyTorch sort/cumsum/gather code path."""
    xm = jnp.moveaxis(x, dim, -1).astype(jnp.float32)
    xm = xm - jnp.max(xm, axis=-1, keepdims=True)
    srt = -jnp.sort(-xm, axis=-1)
    csum = jnp.cumsum(srt, axis=-1) - 1.0
    rho = jnp.arange(1, xm.shape[-1] + 1, dtype=xm.dtype)
    support = rho * srt > csum
    k = jnp.sum(support, axis=-1, keepdims=True)
    tau = jnp.take_along_axis(csum, k - 1, axis=-1) / k.astype(xm.dtype)
    out = jnp.maximum(xm - tau, 0.0)
    return jnp.moveaxis(out.astype(x.dtype), -1, dim)


if __name__ == "__main__":
    key = jax.random.PRNGKey(0)
    k1, k2 = jax.random.split(key)

    # Module default: sparsemax along dim=0 (lane-dense small-D path, D=32).
    x1 = jax.random.normal(k1, (32, 4, 8), dtype=jnp.float32)
    mod = Sparsemax(dim=0)
    out1 = jax.block_until_ready(mod(x1))
    ref1 = _sparsemax_ref(x1, dim=0)
    assert out1.shape == x1.shape and out1.dtype == x1.dtype
    assert jnp.allclose(out1, ref1, atol=1e-5, rtol=1e-5), "mismatch (dim=0)"
    assert jnp.allclose(jnp.sum(out1, axis=0), 1.0, atol=1e-4)

    # Last-dim sparsemax with D >= 128 (row-major doubly-chunked path, D=256).
    x2 = jax.random.normal(k2, (4, 6, 256), dtype=jnp.float32)
    out2 = jax.block_until_ready(sparsemax(x2, dim=-1))
    ref2 = _sparsemax_ref(x2, dim=-1)
    assert out2.shape == x2.shape and out2.dtype == x2.dtype
    assert jnp.allclose(out2, ref2, atol=1e-5, rtol=1e-5), "mismatch (dim=-1)"
    assert jnp.allclose(jnp.sum(out2, axis=-1), 1.0, atol=1e-4)

    print("KERNEL_OK")
</pallas_src>

<mosaic_0001>
module attributes {stable_mosaic.version = 11 : i64} {
  func.func @_sparsemax_lane_kernel(%arg0: i32, %arg1: memref<32x128xf32, #tpu.memory_space<vmem>>, %arg2: memref<32x128xf32, #tpu.memory_space<vmem>>) attributes {dimension_semantics = [#tpu.dimension_semantics<parallel>], iteration_bounds = array<i64: 1>, scalar_prefetch = 0 : i64, scratch_operands = 0 : i64, tpu.core_type = #tpu.core_type<tc>, window_params = [{transform_indices = @transform_0, window_bounds = array<i64: 32, 128>}, {transform_indices = @transform_1, window_bounds = array<i64: 32, 128>}]} {
    %c0 = arith.constant 0 : index
    %c0_0 = arith.constant 0 : index
    %0 = vector.load %arg1[%c0, %c0_0] : memref<32x128xf32, #tpu.memory_space<vmem>>, vector<32x128xf32>
    %cst = arith.constant dense<0xFF800000> : vector<128xf32>
    %1 = vector.multi_reduction <maximumf>, %0, %cst [0] : vector<32x128xf32> to vector<128xf32>
    %2 = vector.shape_cast %1 : vector<128xf32> to vector<1x128xf32>
    %3 = vector.broadcast %2 : vector<1x128xf32> to vector<32x128xf32>
    %4 = arith.subf %0, %3 : vector<32x128xf32>
    %5 = vector.shape_cast %4 : vector<32x128xf32> to vector<32x1x128xf32>
    %6 = vector.shape_cast %4 : vector<32x128xf32> to vector<1x32x128xf32>
    %7 = vector.broadcast %5 : vector<32x1x128xf32> to vector<32x32x128xf32>
    %8 = vector.broadcast %6 : vector<1x32x128xf32> to vector<32x32x128xf32>
    %9 = arith.subf %7, %8 : vector<32x32x128xf32>
    %cst_1 = arith.constant 0.000000e+00 : f32
    %10 = vector.broadcast %cst_1 : f32 to vector<32x32x128xf32>
    %11 = arith.maximumf %9, %10 : vector<32x32x128xf32>
    %cst_2 = arith.constant dense<0.000000e+00> : vector<32x128xf32>
    %12 = vector.multi_reduction <add>, %11, %cst_2 [0] : vector<32x32x128xf32> to vector<32x128xf32>
    %cst_3 = arith.constant 1.000000e+00 : f32
    %13 = vector.broadcast %cst_3 : f32 to vector<32x128xf32>
    %14 = arith.cmpf olt, %12, %13 : vector<32x128xf32>
    %15 = arith.extui %14 : vector<32x128xi1> to vector<32x128xi32>
    %16 = arith.sitofp %15 : vector<32x128xi32> to vector<32x128xf32>
    %cst_4 = arith.constant dense<0.000000e+00> : vector<128xf32>
    %17 = vector.multi_reduction <add>, %16, %cst_4 [0] : vector<32x128xf32> to vector<128xf32>
    %18 = vector.shape_cast %17 : vector<128xf32> to vector<1x128xf32>
    %19 = arith.mulf %4, %16 : vector<32x128xf32>
    %cst_5 = arith.constant dense<0.000000e+00> : vector<128xf32>
    %20 = vector.multi_reduction <add>, %19, %cst_5 [0] : vector<32x128xf32> to vector<128xf32>
    %21 = vector.shape_cast %20 : vector<128xf32> to vector<1x128xf32>
    %cst_6 = arith.constant 1.000000e+00 : f32
    %22 = vector.broadcast %cst_6 : f32 to vector<1x128xf32>
    %23 = arith.subf %21, %22 : vector<1x128xf32>
    %24 = tpu.reciprocal %18 : vector<1x128xf32> -> vector<1x128xf32>
    %25 = arith.mulf %23, %24 : vector<1x128xf32>
    %26 = vector.broadcast %25 : vector<1x128xf32> to vector<32x128xf32>
    %27 = arith.subf %4, %26 : vector<32x128xf32>
    %cst_7 = arith.constant 0.000000e+00 : f32
    %28 = vector.broadcast %cst_7 : f32 to vector<32x128xf32>
    %29 = arith.maximumf %27, %28 : vector<32x128xf32>
    %c0_8 = arith.constant 0 : index
    %c0_9 = arith.constant 0 : index
    %30 = vector.load %arg2[%c0_8, %c0_9] : memref<32x128xf32, #tpu.memory_space<vmem>>, vector<32x128xf32>
    tpu.vector_store %arg2[%c0_8, %c0_9], %29 {strides = array<i32>} : memref<32x128xf32, #tpu.memory_space<vmem>>, vector<32x128xf32>,
    return
  }
  func.func @transform_0(%arg0: i32) -> (i32, i32) {
    %c0_i32 = arith.constant 0 : i32
    %c0_i32_0 = arith.constant 0 : i32
    return %c0_i32, %arg0 : i32, i32
  }
  func.func @transform_1(%arg0: i32) -> (i32, i32) {
    %c0_i32 = arith.constant 0 : i32
    %c0_i32_0 = arith.constant 0 : i32
    return %c0_i32, %arg0 : i32, i32
  }
}

</mosaic_0001>

<bundles_post_ra>
// kernel: tpu_custom_call.1
= control target key start
LH: loop header
LB: loop body
LE: loop exit
PB: predicated region body
PF: predicated region fallthrough
CT: control target
= control target key end

     0   :  { %6 = vsyncpa [#allocation3], 0  ;;  %s1719_s0 = inlined_call_operand.hbm [shape: f32[32,128], index: 0, kind: input, shape index: {}]   ;;  %s1720_s1 = inlined_call_operand.hbm [shape: f32[32,128], index: 1, kind: output, shape index: {}]  }
   0x1   :  { %7 = vsyncpa [#allocation4], 0  ;;  %s907_s6 = smov [#allocation2]   ;;  %s859_s10 = scalar_lea.hbm %s1719_s0, 512 }
   0x2   :  { %s13_s7 = sshll.u32 %s907_s6, 4  ;;  %p860_p0 = scmp.ne.s32.totalorder %s1719_s0, %s859_s10  ;;  %s14_s7 = int_to_ptr.vmem [resolvable:$true] %s13_s7 }
   0x3   :  { %p863_p1 = scmp.lt.u32.totalorder %s859_s10, %s1719_s0 }
   0x5   :  { %p865_p2 = pnand %p863_p1, %p860_p0 }
   0x7   :  { %868 = shalt.err (!%p865_p2)
}
   0x8   :  { %s869_s15 = scalar_lea.vmem %s14_s7, 512  ;;  %p874_p4 = scmp.lt.s32.totalorder %s14_s7, %s14_s7 }
   0x9   :  { %p870_p3 = scmp.ne.s32.totalorder %s14_s7, %s869_s15  ;;  %p875_p5 = scmp.lt.s32.totalorder %s869_s15, %s869_s15 }
   0xb   :  { %p876_p6 = por %p875_p5, %p874_p4 }
   0xd   :  { %p877_p7 = pnand %p876_p6, %p870_p3 }
   0xf   :  { %880 = shalt.err (!%p877_p7)
}
  0x10   :  { %s908_s16 = smov 128   ;;  %s909_s17 = smov 8  }
  0x11   :  { %19 = dma.hbm_to_vmem [thread:$0]  %s1719_s0, 512, %s14_s7, [#allocation3], %s908_s16, %s908_s16, %s909_s17  }
  0x12   :  { %903 = dma.done.wait [#allocation3], 512  }
  0x13   :  { %904 = vsyncadd [#allocation3], 4294966784  ;;  %v23_v0 = vld [vmem:[#allocation2] sm:$0xff]  ;;  %v24_v1 = vld [vmem:[#allocation2 + $0x8] sm:$0xff]  ;;  %v910_v12 = vmov 1966171168   ;;  %v48_v14 = vlaneseq }
  0x14   :  { %v25_v2 = vld [vmem:[#allocation2 + $0x10] sm:$0xff]  ;;  %v26_v3 = vld [vmem:[#allocation2 + $0x18] sm:$0xff]  ;;  %v27_v4 = vmax.f32 %v23_v0, %v24_v1  ;;  %v46_v13 = vunpack.c.l.s4 %v910_v12  ;;  %s912_s0 = smov [#allocation5]  }
  0x15   :  { %v28_v5 = vmax.f32 %v25_v2, %v26_v3  ;;  %v49_v17 = vshrl.u32 %v48_v14, 7  ;;  %s834_s20 = sshll.u32 %s912_s0, 4  ;;  %s835_s20 = int_to_ptr.vmem [resolvable:$true] %s834_s20 }
  0x16   :  { %v47_v16 = vunpack.c.0.s8 %v46_v13  ;;  %s881_s21 = scalar_lea.vmem %s835_s20, 512  ;;  %p886_p9 = scmp.lt.s32.totalorder %s835_s20, %s835_s20 }
  0x17   :  { %v29_v6 = vmax.f32 %v27_v4, %v28_v5  ;;  %v958_v39 = vsub.s32 0, %v49_v17  ;;  %p882_p8 = scmp.ne.s32.totalorder %s835_s20, %s881_s21  ;;  %p887_p10 = scmp.lt.s32.totalorder %s881_s21, %s881_s21 }
  0x18   :  { %v50_v19 = vsub.s32 %v47_v16, %v49_v17 }
  0x19   :  { %v30_v7 = vrot.slane %v29_v6, 4  ;;  %p888_p11 = por %p887_p10, %p886_p9 }
  0x1b   :  { %v31_v8 = vmax.f32 %v29_v6, %v30_v7  ;;  %p889_p12 = pnand %p888_p11, %p882_p8 }
  0x1d   :  { %v32_v9 = vrot.slane %v31_v8, 2 }
  0x1f   :  { %v33_v10 = vmax.f32 %v31_v8, %v32_v9 }
  0x21   :  { %v34_v11 = vrot.slane %v33_v10, 1 }
  0x23   :  { %v35_v15 = vmax.f32 %v33_v10, %v34_v11 }
  0x25   :  { %v938_v18 = vsub.f32 %v23_v0, %v35_v15  ;;  %v940_v20 = vsub.f32 %v24_v1, %v35_v15  ;;  %v944_v22 = vsub.f32 %v25_v2, %v35_v15  ;;  %v952_v28 = vsub.f32 %v26_v3, %v35_v15 }
  0x27   :  { %v44_v21 = vcombine.high %v938_v18, %v938_v18  ;;  %v93_v23 = vcombine.high %v940_v20, %v940_v20  ;;  %v51_v24 = vrot.slane %v938_v18, %v50_v19  ;;  %v142_v25 = vcombine.high %v944_v22, %v944_v22 }
  0x28   :  { %v100_v27 = vrot.slane %v940_v20, %v50_v19  ;;  %v149_v31 = vrot.slane %v944_v22, %v50_v19  ;;  %v191_v34 = vcombine.high %v952_v28, %v952_v28  ;;  %v198_v38 = vrot.slane %v952_v28, %v50_v19 }
  0x29   :  { %v58_v26 = vrot.slane %v44_v21, %v50_v19  ;;  %v107_v29 = vrot.slane %v93_v23, %v50_v19  ;;  %v59_v30 = vcombine.high %v51_v24, %v51_v24  ;;  %v67_v32 = vrot.slane %v51_v24, %v50_v19 }
  0x2a   :  { %v156_v33 = vrot.slane %v142_v25, %v50_v19  ;;  %v108_v36 = vcombine.high %v100_v27, %v100_v27  ;;  %v116_v42 = vrot.slane %v100_v27, %v50_v19  ;;  %v157_v43 = vcombine.high %v149_v31, %v149_v31 }
  0x2b   :  { %v60_v35 = vcombine.high %v58_v26, %v58_v26  ;;  %v109_v37 = vcombine.high %v107_v29, %v107_v29  ;;  %v74_v40 = vrot.slane %v58_v26, %v50_v19  ;;  %v81_v41 = vrot.slane %v59_v30, %v50_v19 }
  0x2c   :  { %v89_v44 = vcombine.high %v67_v32, %v67_v32  ;;  %v123_v45 = vrot.slane %v107_v29, %v50_v19  ;;  %v158_v46 = vcombine.high %v156_v33, %v156_v33  ;;  %v205_v47 = vrot.slane %v191_v34, %v50_v19 }
  0x2d   :  { %v88_v48 = vrot.slane %v60_v35, %v50_v19  ;;  %v90_v49 = vcombine.high %v74_v40, %v74_v40  ;;  %v130_v50 = vrot.slane %v108_v36, %v50_v19  ;;  %v138_v51 = vcombine.high %v116_v42, %v116_v42 }
  0x2e   :  { %v91_v52 = vcombine.high %v81_v41, %v81_v41  ;;  %v137_v53 = vrot.slane %v109_v37, %v50_v19  ;;  %v139_v54 = vcombine.high %v123_v45, %v123_v45  ;;  %v206_v55 = vcombine.high %v198_v38, %v198_v38 }
  0x2f   :  { %v140_v56 = vcombine.high %v130_v50, %v130_v50  ;;  %v165_v57 = vrot.slane %v149_v31, %v50_v19  ;;  %v172_v58 = vrot.slane %v156_v33, %v50_v19  ;;  %v179_v59 = vrot.slane %v157_v43, %v50_v19 }
  0x30   :  { %v92_v60 = vcombine.high %v88_v48, %v88_v48  ;;  %v141_v61 = vcombine.high %v137_v53, %v137_v53  ;;  %v186_v62 = vrot.slane %v158_v46, %v50_v19  ;;  %v207_v63 = vcombine.high %v205_v47, %v205_v47 }
  0x31   :  { %v187_v0 = vcombine.high %v165_v57, %v165_v57  ;;  %v188_v1 = vcombine.high %v172_v58, %v172_v58  ;;  %v189_v2 = vcombine.high %v179_v59, %v179_v59  ;;  %v214_v3 = vrot.slane %v198_v38, %v50_v19 }
  0x32   :  { %v190_v4 = vcombine.high %v186_v62, %v186_v62  ;;  %v221_v5 = vrot.slane %v205_v47, %v50_v19  ;;  %v228_v6 = vrot.slane %v206_v55, %v50_v19  ;;  %v961_v7 = vrot.slane %v67_v32, %v958_v39 }
  0x33   :  { %v236_v8 = vcombine.high %v214_v3, %v214_v3  ;;  %v964_v9 = vrot.slane %v81_v41, %v958_v39  ;;  %v967_v10 = vrot.slane %v89_v44, %v958_v39  ;;  %v970_v11 = vrot.slane %v91_v52, %v958_v39 }
  0x34   :  { %v235_v12 = vrot.slane %v207_v63, %v50_v19  ;;  %v237_v13 = vcombine.high %v221_v5, %v221_v5  ;;  %v238_v14 = vcombine.high %v228_v6, %v228_v6  ;;  %v973_v15 = vrot.slane %v74_v40, %v958_v39 }
  0x35   :  { %v976_v16 = vrot.slane %v88_v48, %v958_v39  ;;  %v979_v17 = vrot.slane %v90_v49, %v958_v39  ;;  %v982_v21 = vrot.slane %v92_v60, %v958_v39  ;;  %v985_v23 = vrot.slane %v116_v42, %v958_v39 }
  0x36   :  { %v239_v24 = vcombine.high %v235_v12, %v235_v12  ;;  %v988_v19 = vrot.slane %v130_v50, %v958_v39  ;;  %v991_v25 = vrot.slane %v138_v51, %v958_v39  ;;  %v994_v26 = vrot.slane %v140_v56, %v958_v39 }
  0x37   :  { %v997_v27 = vrot.slane %v123_v45, %v958_v39  ;;  %v1000_v29 = vrot.slane %v137_v53, %v958_v39  ;;  %v1003_v30 = vrot.slane %v139_v54, %v958_v39  ;;  %v1006_v31 = vrot.slane %v141_v61, %v958_v39 }
  0x38   :  { %v1009_v32 = vrot.slane %v165_v57, %v958_v39  ;;  %v1012_v33 = vrot.slane %v179_v59, %v958_v39  ;;  %v1015_v34 = vrot.slane %v187_v0, %v958_v39  ;;  %v1018_v35 = vrot.slane %v189_v2, %v958_v39 }
  0x39   :  { %v1021_v36 = vrot.slane %v172_v58, %v958_v39  ;;  %v1024_v37 = vrot.slane %v186_v62, %v958_v39  ;;  %v1027_v38 = vrot.slane %v188_v1, %v958_v39  ;;  %v1030_v40 = vrot.slane %v190_v4, %v958_v39 }
  0x3a   :  { %v1033_v41 = vrot.slane %v214_v3, %v958_v39  ;;  %v1036_v42 = vrot.slane %v228_v6, %v958_v39  ;;  %v1039_v43 = vrot.slane %v236_v8, %v958_v39  ;;  %v1042_v44 = vrot.slane %v238_v14, %v958_v39 }
  0x3b   :  { %v1045_v45 = vrot.slane %v221_v5, %v958_v39  ;;  %v1048_v46 = vrot.slane %v235_v12, %v958_v39  ;;  %v1051_v47 = vrot.slane %v237_v13, %v958_v39  ;;  %v1054_v48 = vrot.slane %v239_v24, %v958_v39 }
  0x3c   :  { %v400_v49 = vsub.f32 %v961_v7, %v938_v18  ;;  %v401_v50 = vsub.f32 %v961_v7, %v940_v20  ;;  %v402_v51 = vsub.f32 %v961_v7, %v944_v22  ;;  %v403_v52 = vsub.f32 %v961_v7, %v952_v28 }
  0x3d   :  { %v404_v53 = vsub.f32 %v964_v9, %v938_v18  ;;  %v405_v54 = vsub.f32 %v964_v9, %v940_v20  ;;  %v406_v39 = vsub.f32 %v964_v9, %v944_v22  ;;  %v407_v55 = vsub.f32 %v964_v9, %v952_v28 }
  0x3e   :  { %v408_v56 = vsub.f32 %v967_v10, %v938_v18  ;;  %v409_v57 = vsub.f32 %v967_v10, %v940_v20  ;;  %v410_v58 = vsub.f32 %v967_v10, %v944_v22  ;;  %v411_v59 = vsub.f32 %v967_v10, %v952_v28 }
  0x3f   :  { %v412_v60 = vsub.f32 %v970_v11, %v938_v18  ;;  %v413_v61 = vsub.f32 %v970_v11, %v940_v20  ;;  %v414_v62 = vsub.f32 %v970_v11, %v944_v22  ;;  %v415_v63 = vsub.f32 %v970_v11, %v952_v28 }
  0x40   :  { %v416_v0 = vsub.f32 %v973_v15, %v938_v18  ;;  %v417_v1 = vsub.f32 %v973_v15, %v940_v20  ;;  %v418_v2 = vsub.f32 %v973_v15, %v944_v22  ;;  %v419_v3 = vsub.f32 %v973_v15, %v952_v28 }
  0x41   :  { %v420_v4 = vsub.f32 %v976_v16, %v938_v18  ;;  %v518_v24 = vsub.f32 %v1048_v46, %v944_v22  ;;  %v522_v12 = vsub.f32 %v1051_v47, %v944_v22  ;;  %v528_v14 = vmax.f32 %v400_v49, 0.0 }
  0x42   :  { %v529_v5 = vmax.f32 %v401_v50, 0.0  ;;  %v530_v6 = vmax.f32 %v402_v51, 0.0  ;;  %v531_v8 = vmax.f32 %v403_v52, 0.0  ;;  %v532_v13 = vmax.f32 %v404_v53, 0.0 }
  0x43   :  { %v533_v49 = vmax.f32 %v405_v54, 0.0  ;;  %v534_v50 = vmax.f32 %v406_v39, 0.0  ;;  %v535_v51 = vmax.f32 %v407_v55, 0.0  ;;  %v536_v39 = vmax.f32 %v408_v56, 0.0 }
  0x44   :  { %v537_v9 = vmax.f32 %v409_v57, 0.0  ;;  %v538_v55 = vmax.f32 %v410_v58, 0.0  ;;  %v539_v52 = vmax.f32 %v411_v59, 0.0  ;;  %v540_v54 = vmax.f32 %v412_v60, 0.0 }
  0x45   :  { %v541_v56 = vmax.f32 %v413_v61, 0.0  ;;  %v542_v57 = vmax.f32 %v414_v62, 0.0  ;;  %v543_v58 = vmax.f32 %v415_v63, 0.0  ;;  %v656_v53 = vadd.f32 %v532_v13, %v528_v14 }
  0x46   :  { %v687_v7 = vadd.f32 %v533_v49, %v529_v5  ;;  %v718_v10 = vadd.f32 %v534_v50, %v530_v6  ;;  %v749_v59 = vadd.f32 %v535_v51, %v531_v8  ;;  %v544_v60 = vmax.f32 %v416_v0, 0.0 }
  0x47   :  { %v545_v61 = vmax.f32 %v417_v1, 0.0  ;;  %v546_v62 = vmax.f32 %v418_v2, 0.0  ;;  %v547_v11 = vmax.f32 %v419_v3, 0.0  ;;  %v657_v63 = vadd.f32 %v656_v53, %v536_v39 }
  0x48   :  { %v688_v5 = vadd.f32 %v687_v7, %v537_v9  ;;  %v719_v6 = vadd.f32 %v718_v10, %v538_v55  ;;  %v750_v8 = vadd.f32 %v749_v59, %v539_v52  ;;  %v548_v0 = vmax.f32 %v420_v4, 0.0 }
  0x49   :  { %v1721_v13 = vsub.f32 %v976_v16, %v940_v20  ;;  %v1722_v14 = vsub.f32 %v976_v16, %v944_v22  ;;  %v1723_v15 = vsub.f32 %v976_v16, %v952_v28  ;;  %v658_v49 = vadd.f32 %v657_v63, %v540_v54 }
  0x4a   :  { %v689_v50 = vadd.f32 %v688_v5, %v541_v56  ;;  %v720_v51 = vadd.f32 %v719_v6, %v542_v57  ;;  %v751_v7 = vadd.f32 %v750_v8, %v543_v58  ;;  %v1724_v52 = vsub.f32 %v979_v17, %v938_v18 }
  0x4b   :  { %v549_v1 = vmax.f32 %v1721_v13, 0.0  ;;  %v550_v2 = vmax.f32 %v1722_v14, 0.0  ;;  %v551_v3 = vmax.f32 %v1723_v15, 0.0  ;;  %v1725_v53 = vsub.f32 %v979_v17, %v940_v20 }
  0x4c   :  { %v552_v4 = vmax.f32 %v1724_v52, 0.0  ;;  %v1726_v9 = vsub.f32 %v979_v17, %v944_v22  ;;  %v1727_v16 = vsub.f32 %v979_v17, %v952_v28  ;;  %v659_v54 = vadd.f32 %v658_v49, %v544_v60 }
  0x4d   :  { %v553_v39 = vmax.f32 %v1725_v53, 0.0  ;;  %v690_v56 = vadd.f32 %v689_v50, %v545_v61  ;;  %v721_v57 = vadd.f32 %v720_v51, %v546_v62  ;;  %v752_v58 = vadd.f32 %v751_v7, %v547_v11 }
  0x4e   :  { %v554_v55 = vmax.f32 %v1726_v9, 0.0  ;;  %v555_v10 = vmax.f32 %v1727_v16, 0.0  ;;  %v1728_v59 = vsub.f32 %v982_v21, %v938_v18  ;;  %v1729_v5 = vsub.f32 %v982_v21, %v940_v20 }
  0x4f   :  { %v1730_v8 = vsub.f32 %v982_v21, %v944_v22  ;;  %v1731_v17 = vsub.f32 %v982_v21, %v952_v28  ;;  %v660_v60 = vadd.f32 %v659_v54, %v548_v0  ;;  %v691_v61 = vadd.f32 %v690_v56, %v549_v1 }
  0x50   :  { %v556_v63 = vmax.f32 %v1728_v59, 0.0  ;;  %v557_v6 = vmax.f32 %v1729_v5, 0.0  ;;  %v722_v62 = vadd.f32 %v721_v57, %v550_v2  ;;  %v753_v11 = vadd.f32 %v752_v58, %v551_v3 }
  0x51   :  { %v558_v13 = vmax.f32 %v1730_v8, 0.0  ;;  %v559_v14 = vmax.f32 %v1731_v17, 0.0  ;;  %v1732_v15 = vsub.f32 %v985_v23, %v938_v18  ;;  %v1733_v50 = vsub.f32 %v985_v23, %v940_v20 }
  0x52   :  { %v1734_v7 = vsub.f32 %v985_v23, %v944_v22  ;;  %v1735_v21 = vsub.f32 %v985_v23, %v952_v28  ;;  %v661_v0 = vadd.f32 %v660_v60, %v552_v4  ;;  %v692_v1 = vadd.f32 %v691_v61, %v553_v39 }
  0x53   :  { %v560_v49 = vmax.f32 %v1732_v15, 0.0  ;;  %v561_v51 = vmax.f32 %v1733_v50, 0.0  ;;  %v723_v2 = vadd.f32 %v722_v62, %v554_v55  ;;  %v754_v3 = vadd.f32 %v753_v11, %v555_v10 }
  0x54   :  { %v562_v52 = vmax.f32 %v1734_v7, 0.0  ;;  %v563_v53 = vmax.f32 %v1735_v21, 0.0  ;;  %v1736_v9 = vsub.f32 %v988_v19, %v938_v18  ;;  %v1737_v54 = vsub.f32 %v988_v19, %v940_v20 }
  0x55   :  { %v1738_v57 = vsub.f32 %v988_v19, %v944_v22  ;;  %v1739_v23 = vsub.f32 %v988_v19, %v952_v28  ;;  %v662_v4 = vadd.f32 %v661_v0, %v556_v63  ;;  %v693_v39 = vadd.f32 %v692_v1, %v557_v6 }
  0x56   :  { %v564_v16 = vmax.f32 %v1736_v9, 0.0  ;;  %v565_v56 = vmax.f32 %v1737_v54, 0.0  ;;  %v724_v55 = vadd.f32 %v723_v2, %v558_v13  ;;  %v755_v10 = vadd.f32 %v754_v3, %v559_v14 }
  0x57   :  { %v566_v58 = vmax.f32 %v1738_v57, 0.0  ;;  %v567_v59 = vmax.f32 %v1739_v23, 0.0  ;;  %v1740_v5 = vsub.f32 %v991_v25, %v938_v18  ;;  %v1741_v17 = vsub.f32 %v991_v25, %v940_v20 }
  0x58   :  { %v1742_v61 = vsub.f32 %v991_v25, %v944_v22  ;;  %v1743_v19 = vsub.f32 %v991_v25, %v952_v28  ;;  %v663_v63 = vadd.f32 %v662_v4, %v560_v49  ;;  %v694_v6 = vadd.f32 %v693_v39, %v561_v51 }
  0x59   :  { %v568_v8 = vmax.f32 %v1740_v5, 0.0  ;;  %v569_v60 = vmax.f32 %v1741_v17, 0.0  ;;  %v725_v13 = vadd.f32 %v724_v55, %v562_v52  ;;  %v756_v14 = vadd.f32 %v755_v10, %v563_v53 }
  0x5a   :  { %v570_v62 = vmax.f32 %v1742_v61, 0.0  ;;  %v571_v11 = vmax.f32 %v1743_v19, 0.0  ;;  %v1744_v15 = vsub.f32 %v994_v26, %v938_v18  ;;  %v1745_v7 = vsub.f32 %v994_v26, %v940_v20 }
  0x5b   :  { %v1746_v0 = vsub.f32 %v994_v26, %v944_v22  ;;  %v1747_v25 = vsub.f32 %v994_v26, %v952_v28  ;;  %v664_v49 = vadd.f32 %v663_v63, %v564_v16  ;;  %v695_v51 = vadd.f32 %v694_v6, %v565_v56 }
  0x5c   :  { %v572_v50 = vmax.f32 %v1744_v15, 0.0  ;;  %v573_v21 = vmax.f32 %v1745_v7, 0.0  ;;  %v726_v52 = vadd.f32 %v725_v13, %v566_v58  ;;  %v757_v53 = vadd.f32 %v756_v14, %v567_v59 }
  0x5d   :  { %v574_v1 = vmax.f32 %v1746_v0, 0.0  ;;  %v575_v2 = vmax.f32 %v1747_v25, 0.0  ;;  %v1748_v3 = vsub.f32 %v997_v27, %v938_v18  ;;  %v1749_v54 = vsub.f32 %v997_v27, %v940_v20 }
  0x5e   :  { %v1750_v23 = vsub.f32 %v997_v27, %v944_v22  ;;  %v1751_v26 = vsub.f32 %v997_v27, %v952_v28  ;;  %v665_v16 = vadd.f32 %v664_v49, %v568_v8  ;;  %v696_v56 = vadd.f32 %v695_v51, %v569_v60 }
  0x5f   :  { %v576_v9 = vmax.f32 %v1748_v3, 0.0  ;;  %v577_v57 = vmax.f32 %v1749_v54, 0.0  ;;  %v727_v58 = vadd.f32 %v726_v52, %v570_v62  ;;  %v758_v59 = vadd.f32 %v757_v53, %v571_v11 }
  0x60   :  { %v578_v4 = vmax.f32 %v1750_v23, 0.0  ;;  %v579_v39 = vmax.f32 %v1751_v26, 0.0  ;;  %v1752_v55 = vsub.f32 %v1000_v29, %v938_v18  ;;  %v1753_v5 = vsub.f32 %v1000_v29, %v940_v20 }
  0x61   :  { %v1754_v61 = vsub.f32 %v1000_v29, %v944_v22  ;;  %v1755_v27 = vsub.f32 %v1000_v29, %v952_v28  ;;  %v666_v8 = vadd.f32 %v665_v16, %v572_v50  ;;  %v697_v60 = vadd.f32 %v696_v56, %v573_v21 }
  0x62   :  { %v580_v10 = vmax.f32 %v1752_v55, 0.0  ;;  %v581_v17 = vmax.f32 %v1753_v5, 0.0  ;;  %v728_v62 = vadd.f32 %v727_v58, %v574_v1  ;;  %v759_v11 = vadd.f32 %v758_v59, %v575_v2 }
  0x63   :  { %v582_v19 = vmax.f32 %v1754_v61, 0.0  ;;  %v583_v63 = vmax.f32 %v1755_v27, 0.0  ;;  %v1756_v6 = vsub.f32 %v1003_v30, %v938_v18  ;;  %v1757_v14 = vsub.f32 %v1003_v30, %v940_v20 }
  0x64   :  { %v1758_v7 = vsub.f32 %v1003_v30, %v944_v22  ;;  %v1759_v29 = vsub.f32 %v1003_v30, %v952_v28  ;;  %v667_v50 = vadd.f32 %v666_v8, %v576_v9  ;;  %v698_v21 = vadd.f32 %v697_v60, %v577_v57 }
  0x65   :  { %v584_v13 = vmax.f32 %v1756_v6, 0.0  ;;  %v585_v15 = vmax.f32 %v1757_v14, 0.0  ;;  %v729_v1 = vadd.f32 %v728_v62, %v578_v4  ;;  %v760_v2 = vadd.f32 %v759_v11, %v579_v39 }
  0x66   :  { %v586_v0 = vmax.f32 %v1758_v7, 0.0  ;;  %v587_v25 = vmax.f32 %v1759_v29, 0.0  ;;  %v1760_v49 = vsub.f32 %v1006_v31, %v938_v18  ;;  %v1761_v52 = vsub.f32 %v1006_v31, %v940_v20 }
  0x67   :  { %v1762_v3 = vsub.f32 %v1006_v31, %v944_v22  ;;  %v1763_v30 = vsub.f32 %v1006_v31, %v952_v28  ;;  %v668_v9 = vadd.f32 %v667_v50, %v580_v10  ;;  %v699_v57 = vadd.f32 %v698_v21, %v581_v17 }
  0x68   :  { %v588_v51 = vmax.f32 %v1760_v49, 0.0  ;;  %v589_v53 = vmax.f32 %v1761_v52, 0.0  ;;  %v730_v4 = vadd.f32 %v729_v1, %v582_v19  ;;  %v761_v26 = vadd.f32 %v760_v2, %v583_v63 }
  0x69   :  { %v590_v54 = vmax.f32 %v1762_v3, 0.0  ;;  %v591_v23 = vmax.f32 %v1763_v30, 0.0  ;;  %v1764_v39 = vsub.f32 %v1009_v32, %v938_v18  ;;  %v1765_v56 = vsub.f32 %v1009_v32, %v940_v20 }
  0x6a   :  { %v1766_v59 = vsub.f32 %v1009_v32, %v944_v22  ;;  %v1767_v31 = vsub.f32 %v1009_v32, %v952_v28  ;;  %v669_v10 = vadd.f32 %v668_v9, %v584_v13  ;;  %v700_v17 = vadd.f32 %v699_v57, %v585_v15 }
  0x6b   :  { %v592_v16 = vmax.f32 %v1764_v39, 0.0  ;;  %v593_v58 = vmax.f32 %v1765_v56, 0.0  ;;  %v731_v61 = vadd.f32 %v730_v4, %v586_v0  ;;  %v762_v19 = vadd.f32 %v761_v26, %v587_v25 }
  0x6c   :  { %v594_v55 = vmax.f32 %v1766_v59, 0.0  ;;  %v595_v5 = vmax.f32 %v1767_v31, 0.0  ;;  %v1768_v27 = vsub.f32 %v1012_v33, %v938_v18  ;;  %v1769_v8 = vsub.f32 %v1012_v33, %v940_v20 }
  0x6d   :  { %v1770_v62 = vsub.f32 %v1012_v33, %v944_v22  ;;  %v1771_v32 = vsub.f32 %v1012_v33, %v952_v28  ;;  %v670_v13 = vadd.f32 %v669_v10, %v588_v51  ;;  %v701_v14 = vadd.f32 %v700_v17, %v589_v53 }
  0x6e   :  { %v596_v63 = vmax.f32 %v1768_v27, 0.0  ;;  %v597_v60 = vmax.f32 %v1769_v8, 0.0  ;;  %v732_v15 = vadd.f32 %v731_v61, %v590_v54  ;;  %v763_v7 = vadd.f32 %v762_v19, %v591_v23 }
  0x6f   :  { %v598_v11 = vmax.f32 %v1770_v62, 0.0  ;;  %v599_v6 = vmax.f32 %v1771_v32, 0.0  ;;  %v1772_v0 = vsub.f32 %v1015_v34, %v938_v18  ;;  %v1773_v25 = vsub.f32 %v1015_v34, %v940_v20 }
  0x70   :  { %v1774_v21 = vsub.f32 %v1015_v34, %v944_v22  ;;  %v1775_v33 = vsub.f32 %v1015_v34, %v952_v28  ;;  %v671_v49 = vadd.f32 %v670_v13, %v592_v16  ;;  %v702_v51 = vadd.f32 %v701_v14, %v593_v58 }
  0x71   :  { %v600_v29 = vmax.f32 %v1772_v0, 0.0  ;;  %v601_v50 = vmax.f32 %v1773_v25, 0.0  ;;  %v733_v52 = vadd.f32 %v732_v15, %v594_v55  ;;  %v764_v53 = vadd.f32 %v763_v7, %v595_v5 }
  0x72   :  { %v602_v1 = vmax.f32 %v1774_v21, 0.0  ;;  %v603_v2 = vmax.f32 %v1775_v33, 0.0  ;;  %v1776_v3 = vsub.f32 %v1018_v35, %v938_v18  ;;  %v1777_v30 = vsub.f32 %v1018_v35, %v940_v20 }
  0x73   :  { %v1778_v9 = vsub.f32 %v1018_v35, %v944_v22  ;;  %v1779_v34 = vsub.f32 %v1018_v35, %v952_v28  ;;  %v672_v26 = vadd.f32 %v671_v49, %v596_v63  ;;  %v703_v39 = vadd.f32 %v702_v51, %v597_v60 }
  0x74   :  { %v604_v54 = vmax.f32 %v1776_v3, 0.0  ;;  %v605_v23 = vmax.f32 %v1777_v30, 0.0  ;;  %v734_v16 = vadd.f32 %v733_v52, %v598_v11  ;;  %v765_v56 = vadd.f32 %v764_v53, %v599_v6 }
  0x75   :  { %v606_v57 = vmax.f32 %v1778_v9, 0.0  ;;  %v607_v4 = vmax.f32 %v1779_v34, 0.0  ;;  %v1780_v58 = vsub.f32 %v1021_v36, %v938_v18  ;;  %v1781_v55 = vsub.f32 %v1021_v36, %v940_v20 }
  0x76   :  { %v1782_v5 = vsub.f32 %v1021_v36, %v944_v22  ;;  %v1783_v35 = vsub.f32 %v1021_v36, %v952_v28  ;;  %v673_v61 = vadd.f32 %v672_v26, %v600_v29  ;;  %v704_v19 = vadd.f32 %v703_v39, %v601_v50 }
  0x77   :  { %v608_v59 = vmax.f32 %v1780_v58, 0.0  ;;  %v609_v31 = vmax.f32 %v1781_v55, 0.0  ;;  %v735_v27 = vadd.f32 %v734_v16, %v602_v1  ;;  %v766_v63 = vadd.f32 %v765_v56, %v603_v2 }
  0x78   :  { %v610_v10 = vmax.f32 %v1782_v5, 0.0  ;;  %v611_v17 = vmax.f32 %v1783_v35, 0.0  ;;  %v1784_v8 = vsub.f32 %v1024_v37, %v938_v18  ;;  %v1785_v62 = vsub.f32 %v1024_v37, %v940_v20 }
  0x79   :  { %v1786_v32 = vsub.f32 %v1024_v37, %v944_v22  ;;  %v1787_v36 = vsub.f32 %v1024_v37, %v952_v28  ;;  %v674_v14 = vadd.f32 %v673_v61, %v604_v54  ;;  %v705_v15 = vadd.f32 %v704_v19, %v605_v23 }
  0x7a   :  { %v612_v60 = vmax.f32 %v1784_v8, 0.0  ;;  %v613_v11 = vmax.f32 %v1785_v62, 0.0  ;;  %v736_v7 = vadd.f32 %v735_v27, %v606_v57  ;;  %v767_v0 = vadd.f32 %v766_v63, %v607_v4 }
  0x7b   :  { %v614_v6 = vmax.f32 %v1786_v32, 0.0  ;;  %v615_v13 = vmax.f32 %v1787_v36, 0.0  ;;  %v1788_v29 = vsub.f32 %v1027_v38, %v938_v18  ;;  %v1789_v50 = vsub.f32 %v1027_v38, %v940_v20 }
  0x7c   :  { %v1790_v1 = vsub.f32 %v1027_v38, %v944_v22  ;;  %v1791_v37 = vsub.f32 %v1027_v38, %v952_v28  ;;  %v675_v49 = vadd.f32 %v674_v14, %v608_v59  ;;  %v706_v51 = vadd.f32 %v705_v15, %v609_v31 }
  0x7d   :  { %v616_v25 = vmax.f32 %v1788_v29, 0.0  ;;  %v617_v21 = vmax.f32 %v1789_v50, 0.0  ;;  %v737_v52 = vadd.f32 %v736_v7, %v610_v10  ;;  %v768_v53 = vadd.f32 %v767_v0, %v611_v17 }
  0x7e   :  { %v618_v33 = vmax.f32 %v1790_v1, 0.0  ;;  %v619_v2 = vmax.f32 %v1791_v37, 0.0  ;;  %v1792_v3 = vsub.f32 %v1030_v40, %v938_v18  ;;  %v1793_v30 = vsub.f32 %v1030_v40, %v940_v20 }
  0x7f   :  { %v1794_v9 = vsub.f32 %v1030_v40, %v944_v22  ;;  %v1795_v38 = vsub.f32 %v1030_v40, %v952_v28  ;;  %v676_v4 = vadd.f32 %v675_v49, %v612_v60  ;;  %v707_v26 = vadd.f32 %v706_v51, %v613_v11 }
  0x80   :  { %v620_v54 = vmax.f32 %v1792_v3, 0.0  ;;  %v621_v23 = vmax.f32 %v1793_v30, 0.0  ;;  %v738_v39 = vadd.f32 %v737_v52, %v614_v6  ;;  %v769_v16 = vadd.f32 %v768_v53, %v615_v13 }
  0x81   :  { %v622_v57 = vmax.f32 %v1794_v9, 0.0  ;;  %v623_v34 = vmax.f32 %v1795_v38, 0.0  ;;  %v1796_v56 = vsub.f32 %v1033_v41, %v938_v18  ;;  %v1797_v59 = vsub.f32 %v1033_v41, %v940_v20 }
  0x82   :  { %v1798_v31 = vsub.f32 %v1033_v41, %v944_v22  ;;  %v1799_v40 = vsub.f32 %v1033_v41, %v952_v28  ;;  %v677_v35 = vadd.f32 %v676_v4, %v616_v25  ;;  %v708_v17 = vadd.f32 %v707_v26, %v617_v21 }
  0x83   :  { %v624_v58 = vmax.f32 %v1796_v56, 0.0  ;;  %v625_v55 = vmax.f32 %v1797_v59, 0.0  ;;  %v739_v61 = vadd.f32 %v738_v39, %v618_v33  ;;  %v770_v19 = vadd.f32 %v769_v16, %v619_v2 }
  0x84   :  { %v626_v5 = vmax.f32 %v1798_v31, 0.0  ;;  %v627_v10 = vmax.f32 %v1799_v40, 0.0  ;;  %v1800_v27 = vsub.f32 %v1036_v42, %v938_v18  ;;  %v1801_v8 = vsub.f32 %v1036_v42, %v940_v20 }
  0x85   :  { %v1802_v62 = vsub.f32 %v1036_v42, %v944_v22  ;;  %v1803_v41 = vsub.f32 %v1036_v42, %v952_v28  ;;  %v678_v6 = vadd.f32 %v677_v35, %v620_v54  ;;  %v709_v36 = vadd.f32 %v708_v17, %v621_v23 }
  0x86   :  { %v628_v63 = vmax.f32 %v1800_v27, 0.0  ;;  %v629_v60 = vmax.f32 %v1801_v8, 0.0  ;;  %v740_v13 = vadd.f32 %v739_v61, %v622_v57  ;;  %v771_v14 = vadd.f32 %v770_v19, %v623_v34 }
  0x87   :  { %v630_v11 = vmax.f32 %v1802_v62, 0.0  ;;  %v631_v32 = vmax.f32 %v1803_v41, 0.0  ;;  %v1804_v15 = vsub.f32 %v1039_v43, %v938_v18  ;;  %v1805_v0 = vsub.f32 %v1039_v43, %v940_v20 }
  0x88   :  { %v1806_v25 = vsub.f32 %v1039_v43, %v944_v22  ;;  %v1807_v42 = vsub.f32 %v1039_v43, %v952_v28  ;;  %v679_v1 = vadd.f32 %v678_v6, %v624_v58  ;;  %v710_v33 = vadd.f32 %v709_v36, %v625_v55 }
  0x89   :  { %v632_v7 = vmax.f32 %v1804_v15, 0.0  ;;  %v633_v29 = vmax.f32 %v1805_v0, 0.0  ;;  %v741_v37 = vadd.f32 %v740_v13, %v626_v5  ;;  %v772_v2 = vadd.f32 %v771_v14, %v627_v10 }
  0x8a   :  { %v634_v50 = vmax.f32 %v1806_v25, 0.0  ;;  %v635_v21 = vmax.f32 %v1807_v42, 0.0  ;;  %v1808_v49 = vsub.f32 %v1042_v44, %v938_v18  ;;  %v1809_v52 = vsub.f32 %v1042_v44, %v940_v20 }
  0x8b   :  { %v1810_v3 = vsub.f32 %v1042_v44, %v944_v22  ;;  %v1811_v43 = vsub.f32 %v1042_v44, %v952_v28  ;;  %v680_v23 = vadd.f32 %v679_v1, %v628_v63  ;;  %v711_v9 = vadd.f32 %v710_v33, %v629_v60 }
  0x8c   :  { %v636_v51 = vmax.f32 %v1808_v49, 0.0  ;;  %v637_v53 = vmax.f32 %v1809_v52, 0.0  ;;  %v742_v57 = vadd.f32 %v741_v37, %v630_v11  ;;  %v773_v38 = vadd.f32 %v772_v2, %v631_v32 }
  0x8d   :  { %v638_v54 = vmax.f32 %v1810_v3, 0.0  ;;  %v639_v30 = vmax.f32 %v1811_v43, 0.0  ;;  %v1812_v34 = vsub.f32 %v1045_v45, %v938_v18  ;;  %v1813_v26 = vsub.f32 %v1045_v45, %v940_v20 }
  0x8e   :  { %v1814_v16 = vsub.f32 %v1045_v45, %v944_v22  ;;  %v1815_v44 = vsub.f32 %v1045_v45, %v952_v28  ;;  %v681_v59 = vadd.f32 %v680_v23, %v632_v7  ;;  %v712_v55 = vadd.f32 %v711_v9, %v633_v29 }
  0x8f   :  { %v640_v4 = vmax.f32 %v1812_v34, 0.0  ;;  %v641_v39 = vmax.f32 %v1813_v26, 0.0  ;;  %v743_v31 = vadd.f32 %v742_v57, %v634_v50  ;;  %v774_v5 = vadd.f32 %v773_v38, %v635_v21 }
  0x90   :  { %v642_v56 = vmax.f32 %v1814_v16, 0.0  ;;  %v643_v58 = vmax.f32 %v1815_v44, 0.0  ;;  %v1816_v40 = vsub.f32 %v1048_v46, %v938_v18  ;;  %v1817_v35 = vsub.f32 %v1048_v46, %v940_v20 }
  0x91   :  { %v646_v61 = vmax.f32 %v518_v24, 0.0  ;;  %v1818_v45 = vsub.f32 %v1048_v46, %v952_v28  ;;  %v682_v27 = vadd.f32 %v681_v59, %v636_v51  ;;  %v713_v63 = vadd.f32 %v712_v55, %v637_v53 }
  0x92   :  { %v644_v10 = vmax.f32 %v1816_v40, 0.0  ;;  %v645_v17 = vmax.f32 %v1817_v35, 0.0  ;;  %v744_v8 = vadd.f32 %v743_v31, %v638_v54  ;;  %v775_v60 = vadd.f32 %v774_v5, %v639_v30 }
  0x93   :  { %v647_v19 = vmax.f32 %v1818_v45, 0.0  ;;  %v1819_v62 = vsub.f32 %v1051_v47, %v938_v18  ;;  %v1820_v41 = vsub.f32 %v1051_v47, %v940_v20  ;;  %v650_v24 = vmax.f32 %v522_v12, 0.0 }
  0x94   :  { %v1821_v46 = vsub.f32 %v1051_v47, %v952_v28  ;;  %v683_v36 = vadd.f32 %v682_v27, %v640_v4  ;;  %v714_v13 = vadd.f32 %v713_v63, %v641_v39  ;;  %v745_v14 = vadd.f32 %v744_v8, %v642_v56 }
  0x95   :  { %v648_v11 = vmax.f32 %v1819_v62, 0.0  ;;  %v649_v32 = vmax.f32 %v1820_v41, 0.0  ;;  %v776_v15 = vadd.f32 %v775_v60, %v643_v58  ;;  %v1822_v7 = vsub.f32 %v1054_v48, %v938_v18 }
  0x96   :  { %v651_v6 = vmax.f32 %v1821_v46, 0.0  ;;  %v1823_v29 = vsub.f32 %v1054_v48, %v940_v20  ;;  %v1824_v50 = vsub.f32 %v1054_v48, %v944_v22  ;;  %v1825_v47 = vsub.f32 %v1054_v48, %v952_v28 }
  0x97   :  { %v652_v0 = vmax.f32 %v1822_v7, 0.0  ;;  %v684_v21 = vadd.f32 %v683_v36, %v644_v10  ;;  %v715_v1 = vadd.f32 %v714_v13, %v645_v17  ;;  %v746_v33 = vadd.f32 %v745_v14, %v646_v61 }
  0x98   :  { %v653_v25 = vmax.f32 %v1823_v29, 0.0  ;;  %v654_v12 = vmax.f32 %v1824_v50, 0.0  ;;  %v655_v42 = vmax.f32 %v1825_v47, 0.0  ;;  %v777_v37 = vadd.f32 %v776_v15, %v647_v19 }
  0x99   :  { %v685_v2 = vadd.f32 %v684_v21, %v648_v11  ;;  %v716_v49 = vadd.f32 %v715_v1, %v649_v32  ;;  %v747_v51 = vadd.f32 %v746_v33, %v650_v24  ;;  %v911_v30 = vmov 0.0  }
  0x9a   :  { %v778_v52 = vadd.f32 %v777_v37, %v651_v6 }
  0x9b   :  { %v686_v53 = vadd.f32 %v685_v2, %v652_v0  ;;  %v717_v3 = vadd.f32 %v716_v49, %v653_v25  ;;  %v748_v54 = vadd.f32 %v747_v51, %v654_v12 }
  0x9c   :  { %v779_v43 = vadd.f32 %v778_v52, %v655_v42 }
  0x9d   :  { %vm780_vm0 = vcmp.lt.f32.partialorder %v686_v53, 1.0  ;;  %vm781_vm1 = vcmp.lt.f32.partialorder %v717_v3, 1.0  ;;  %vm782_vm2 = vcmp.lt.f32.partialorder %v748_v54, 1.0 }
  0x9e   :  { %vm783_vm3 = vcmp.lt.f32.partialorder %v779_v43, 1.0  ;;  %v846_v23 = vsel %vm780_vm0, 1.0, %v911_v30  ;;  %v847_v48 = vsel %vm781_vm1, 1.0, %v911_v30  ;;  %v848_v9 = vsel %vm782_vm2, 1.0, %v911_v30 }
  0x9f   :  { %v792_v57 = vadd.f32 %v847_v48, %v846_v23  ;;  %v801_v38 = vmul.f32 %v846_v23, %v938_v18  ;;  %v802_v34 = vmul.f32 %v847_v48, %v940_v20  ;;  %v803_v4 = vmul.f32 %v848_v9, %v944_v22 }
  0xa0   :  { %v849_v26 = vsel %vm783_vm3, 1.0, %v911_v30 }
  0xa1   :  { %v793_v39 = vadd.f32 %v848_v9, %v792_v57  ;;  %v804_v16 = vmul.f32 %v849_v26, %v952_v28  ;;  %v805_v56 = vadd.f32 %v802_v34, %v801_v38 }
  0xa3   :  { %v794_v44 = vadd.f32 %v849_v26, %v793_v39  ;;  %v806_v58 = vadd.f32 %v805_v56, %v803_v4 }
  0xa5   :  { %v795_v59 = vrot.slane %v794_v44, 4  ;;  %v807_v55 = vadd.f32 %v806_v58, %v804_v16 }
  0xa7   :  { %v796_v31 = vadd.f32 %v795_v59, %v794_v44  ;;  %v808_v5 = vrot.slane %v807_v55, 4 }
  0xa9   :  { %v797_v40 = vrot.slane %v796_v31, 2  ;;  %v809_v10 = vadd.f32 %v808_v5, %v807_v55 }
  0xab   :  { %v798_v35 = vadd.f32 %v797_v40, %v796_v31  ;;  %v810_v17 = vrot.slane %v809_v10, 2 }
  0xad   :  { %v799_v61 = vrot.slane %v798_v35, 1  ;;  %v811_v45 = vadd.f32 %v810_v17, %v809_v10 }
  0xaf   :  { %v800_v19 = vadd.f32 %v799_v61, %v798_v35  ;;  %v812_v27 = vrot.slane %v811_v45, 1 }
  0xb1   :  { %857 = vrcp.f32 %v800_v19  ;;  %v813_v63 = vadd.f32 %v812_v27, %v811_v45 }
  0xb3   :  { %v850_v8 = vadd.f32 -1.0, %v813_v63 }
  0xbb   :  { %v858_v60 = vpop.eup %857 }
  0xbc   :  { %v816_v62 = vmul.f32 %v858_v60, %v850_v8 }
  0xbe   :  { %v817_v11 = vsub.f32 %v938_v18, %v816_v62  ;;  %v818_v41 = vsub.f32 %v940_v20, %v816_v62  ;;  %v819_v32 = vsub.f32 %v944_v22, %v816_v62  ;;  %v820_v24 = vsub.f32 %v952_v28, %v816_v62 }
  0xc0   :  { %v821_v46 = vmax.f32 %v817_v11, 0.0  ;;  %v822_v6 = vmax.f32 %v818_v41, 0.0  ;;  %v823_v36 = vmax.f32 %v819_v32, 0.0  ;;  %v824_v13 = vmax.f32 %v820_v24, 0.0 }
  0xc2   :  { %825 = vst [vmem:[#allocation5] sm:$0xff] %v821_v46  ;;  %826 = vst [vmem:[#allocation5 + $0x8] sm:$0xff] %v822_v6 }
  0xc3   :  { %827 = vst [vmem:[#allocation5 + $0x10] sm:$0xff] %v823_v36  ;;  %828 = vst [vmem:[#allocation5 + $0x18] sm:$0xff] %v824_v13 }
  0xc4   :  { %892 = shalt.err (!%p889_p12)
}
  0xc5   :  { %s893_s24 = scalar_lea.hbm %s1720_s1, 512 }
  0xc6   :  { %p894_p13 = scmp.ne.s32.totalorder %s1720_s1, %s893_s24  ;;  %p897_p0 = scmp.lt.u32.totalorder %s893_s24, %s1720_s1 }
  0xc8   :  { %p899_p1 = pnand %p897_p0, %p894_p13 }
  0xca   :  { %902 = shalt.err (!%p899_p1)
}
  0xcb   :  { %840 = dma.vmem_to_hbm [thread:$0]  %s835_s20, 512, %s1720_s1, [#allocation4], %s908_s16, %s908_s16, %s909_s17  }
  0xcc   :  { %905 = dma.done.wait [#allocation4], 512  }
  0xcd   :  { %906 = vsyncadd [#allocation4], 4294966784 }
  0xce   :  { %844 = vsyncpa [#allocation3], 1 }
  0xcf   :  { %845 = vsyncpa [#allocation4], 1 }

</bundles_post_ra>
